<compile_context>
chip_gen: v6e
topology: v6e:2x2x1
jax: 0.10.0
libtpu: 0.0.40
codegen_flags: <defaults>
</compile_context>

<pallas_src>
import functools
import math

import numpy as np
import jax
import jax.numpy as jnp
from jax.experimental import pallas as pl
from jax.experimental.pallas import tpu as pltpu


# ----------------------------------------------------------------------------
# Shared helpers (pure jnp; usable both inside kernels and in the reference).
# ----------------------------------------------------------------------------
def _layer_norm(x, gamma, beta, eps=1e-5):
    mean = jnp.mean(x, axis=-1, keepdims=True)
    var = jnp.mean(jnp.square(x - mean), axis=-1, keepdims=True)
    return (x - mean) * jax.lax.rsqrt(var + eps) * gamma + beta


def positional_encoding(max_len, dmodel, padding_idx=0):
    """Replicates PositionalEncoding.__init__ exactly (incl. `if padding_idx:`)."""
    pos = np.arange(max_len, dtype=np.float32)[:, None]
    dim = np.arange(dmodel, dtype=np.float32)[None, :]
    arg = pos / np.power(10000.0, 2.0 * dim / float(dmodel))
    pe = np.zeros((max_len, dmodel), dtype=np.float32)
    pe[:, 0::2] = np.sin(arg[:, 0::2])
    pe[:, 1::2] = np.cos(arg[:, 1::2])
    if padding_idx:                      # padding_idx=0 is falsy, as in PyTorch
        pe[padding_idx] = 0.0
    return jnp.asarray(pe)


# ----------------------------------------------------------------------------
# Kernel 1: embedding lookup fused with positional-encoding add.
# (dropout is identity at inference)
# ----------------------------------------------------------------------------
def _embed_pos_kernel(ids_ref, table_ref, pos_ref, out_ref):
    ids = ids_ref[...]                                        # (N, 1) int32
    n = ids.shape[0]
    vocab = table_ref.shape[0]
    class_ids = jax.lax.broadcasted_iota(jnp.int32, (n, vocab), 1)
    onehot = (class_ids == ids).astype(jnp.float32)           # (N, V)
    emb = jnp.dot(onehot, table_ref[...], preferred_element_type=jnp.float32)
    out_ref[...] = emb + pos_ref[...]


def embed_with_positions(token_ids, table, pos_enc):
    # TODO(synk): for large vocabularies replace the one-hot matmul with a
    # scalar-prefetch row gather (PrefetchScalarGridSpec + (1, D) blocks).
    B, S = token_ids.shape
    V, D = table.shape
    n = B * S
    ids2d = token_ids.reshape(n, 1).astype(jnp.int32)
    pos_rows = jnp.broadcast_to(pos_enc[:S][None], (B, S, D)).reshape(n, D)
    out = pl.pallas_call(
        _embed_pos_kernel,
        out_shape=jax.ShapeDtypeStruct((n, D), jnp.float32),
    )(ids2d, table, pos_rows)
    return out.reshape(B, S, D)


# ----------------------------------------------------------------------------
# Kernel 2: one fused TransformerBlock per grid step (grid over batch).
# ----------------------------------------------------------------------------
def _tblock_kernel(x_ref, wq_ref, wk_ref, wv_ref, wo_ref,
                   ln1g_ref, ln1b_ref, w1_ref, b1_ref, w2_ref, b2_ref,
                   ln2g_ref, ln2b_ref, out_ref, *, heads):
    x = x_ref[0]                                              # (S, D) f32
    S, D = x.shape
    dk = D // heads
    scale = jnp.float32(1.0 / math.sqrt(dk))

    # --- Multi-Head Attention ---------------------------------------------
    q = jnp.dot(x, wq_ref[...], preferred_element_type=jnp.float32)
    k = jnp.dot(x, wk_ref[...], preferred_element_type=jnp.float32)
    v = jnp.dot(x, wv_ref[...], preferred_element_type=jnp.float32)

    head_outs = []
    for h in range(heads):                                    # static unroll
        sl = slice(h * dk, (h + 1) * dk)
        s = jnp.dot(q[:, sl], k[:, sl].T,
                    preferred_element_type=jnp.float32) * scale
        s = s - jnp.max(s, axis=-1, keepdims=True)            # stable softmax
        p = jnp.exp(s)
        p = p / jnp.sum(p, axis=-1, keepdims=True)
        head_outs.append(jnp.dot(p, v[:, sl],
                                 preferred_element_type=jnp.float32))
    attn = jnp.concatenate(head_outs, axis=-1)                # (S, D)
    attn = jnp.dot(attn, wo_ref[...], preferred_element_type=jnp.float32)

    # --- residual + LayerNorm 1 ---------------------------------------------
    y = _layer_norm(x + attn, ln1g_ref[...], ln1b_ref[...])

    # --- position-wise FFN (dropout identity at inference) ------------------
    h1 = jnp.dot(y, w1_ref[...], preferred_element_type=jnp.float32) + b1_ref[...]
    h1 = jnp.maximum(h1, 0.0)                                 # ReLU
    ff = jnp.dot(h1, w2_ref[...], preferred_element_type=jnp.float32) + b2_ref[...]

    # --- residual + LayerNorm 2 ---------------------------------------------
    out = _layer_norm(y + ff, ln2g_ref[...], ln2b_ref[...])
    out_ref[0] = out.astype(out_ref.dtype)


def transformer_block_forward(x, blk, heads):
    B, S, D = x.shape
    F = blk['w1'].shape[1]
    kernel = functools.partial(_tblock_kernel, heads=heads)

    def w_spec(shape):
        return pl.BlockSpec(shape, lambda b: (0, 0))          # weights: resident

    return pl.pallas_call(
        kernel,
        out_shape=jax.ShapeDtypeStruct((B, S, D), jnp.float32),
        grid=(B,),
        in_specs=[
            pl.BlockSpec((1, S, D), lambda b: (b, 0, 0)),     # activations
            w_spec((D, D)), w_spec((D, D)), w_spec((D, D)), w_spec((D, D)),
            w_spec((1, D)), w_spec((1, D)),                   # LN1 gamma/beta
            w_spec((D, F)), w_spec((1, F)),                   # FFN layer 1
            w_spec((F, D)), w_spec((1, D)),                   # FFN layer 2
            w_spec((1, D)), w_spec((1, D)),                   # LN2 gamma/beta
        ],
        out_specs=pl.BlockSpec((1, S, D), lambda b: (b, 0, 0)),
        compiler_params=pltpu.CompilerParams(
            dimension_semantics=("parallel",)),               # batch-parallel
    )(x, blk['wq'], blk['wk'], blk['wv'], blk['wo'],
      blk['ln1_g'], blk['ln1_b'], blk['w1'], blk['b1'],
      blk['w2'], blk['b2'], blk['ln2_g'], blk['ln2_b'])


# ----------------------------------------------------------------------------
# Kernel 3: global max-pool over sequence + classifier Linear + log_softmax.
# ----------------------------------------------------------------------------
def _head_kernel(x_ref, w_ref, b_ref, out_ref):
    x = x_ref[...]                                            # (B, S, D)
    pooled = jnp.max(x, axis=1)                               # adaptive_max_pool1d
    logits = jnp.dot(pooled, w_ref[...],
                     preferred_element_type=jnp.float32) + b_ref[...]
    m = jnp.max(logits, axis=-1, keepdims=True)
    lse = m + jnp.log(jnp.sum(jnp.exp(logits - m), axis=-1, keepdims=True))
    out_ref[...] = logits - lse                               # log_softmax


def pooled_classifier(x, w_out, b_out):
    B, S, D = x.shape
    C = w_out.shape[1]
    return pl.pallas_call(
        _head_kernel,
        out_shape=jax.ShapeDtypeStruct((B, C), jnp.float32),
    )(x, w_out, b_out)


# ----------------------------------------------------------------------------
# Full forward (inference semantics: dropout layers are identity).
# ----------------------------------------------------------------------------
def transformer_forward(token_ids, input_lengths, params, *, heads, pos_enc,
                        pooling='max'):
    # TODO(synk): 'avg' pooling branch (sum over seq / input_lengths) not
    # implemented; the module default pooling='max' is implemented.
    assert pooling == 'max'
    del input_lengths                                         # only used by 'avg'
    x = embed_with_positions(token_ids, params['embedding'], pos_enc)
    for blk in params['blocks']:
        x = transformer_block_forward(x, blk, heads)
    return pooled_classifier(x, params['w_out'], params['b_out'])


# ----------------------------------------------------------------------------
# Parameters + pure-JAX reference (mirrors the PyTorch forward exactly).
# ----------------------------------------------------------------------------
def init_params(key, vocab, dmodel, ffnn_hidden, output_size, n_layers):
    keys = jax.random.split(key, 3 + n_layers)
    s = 1.0 / math.sqrt(dmodel)
    params = {
        'embedding': jax.random.normal(keys[0], (vocab, dmodel), jnp.float32),
        'w_out': jax.random.normal(keys[1], (dmodel, output_size), jnp.float32) * s,
        'b_out': jax.random.normal(keys[2], (1, output_size), jnp.float32) * 0.1,
        'blocks': [],
    }
    for n in range(n_layers):
        ks = jax.random.split(keys[3 + n], 8)
        blk = {
            'wq': jax.random.normal(ks[0], (dmodel, dmodel), jnp.float32) * s,
            'wk': jax.random.normal(ks[1], (dmodel, dmodel), jnp.float32) * s,
            'wv': jax.random.normal(ks[2], (dmodel, dmodel), jnp.float32) * s,
            'wo': jax.random.normal(ks[3], (dmodel, dmodel), jnp.float32) * s,
            'ln1_g': jnp.ones((1, dmodel), jnp.float32),
            'ln1_b': jnp.zeros((1, dmodel), jnp.float32),
            'w1': jax.random.normal(ks[4], (dmodel, ffnn_hidden), jnp.float32) * s,
            'b1': jax.random.normal(ks[5], (1, ffnn_hidden), jnp.float32) * 0.1,
            'w2': jax.random.normal(ks[6], (ffnn_hidden, dmodel), jnp.float32)
                  / math.sqrt(ffnn_hidden),
            'b2': jax.random.normal(ks[7], (1, dmodel), jnp.float32) * 0.1,
            'ln2_g': jnp.ones((1, dmodel), jnp.float32),
            'ln2_b': jnp.zeros((1, dmodel), jnp.float32),
        }
        params['blocks'].append(blk)
    return params


def _reference_forward(token_ids, params, pos_enc, heads):
    B, S = token_ids.shape
    table = params['embedding']
    D = table.shape[1]
    x = table[token_ids] + pos_enc[:S][None]                  # embed + pos (+dropout id)
    dk = D // heads
    for blk in params['blocks']:
        q, k, v = (x @ blk['wq'], x @ blk['wk'], x @ blk['wv'])

        def split(t):
            return t.reshape(B, S, heads, dk).transpose(0, 2, 1, 3)

        qh, kh, vh = split(q), split(k), split(v)
        score = jnp.einsum('bhqd,bhkd->bhqk', qh, kh) / math.sqrt(dk)
        p = jax.nn.softmax(score, axis=-1)
        o = jnp.einsum('bhqk,bhkd->bhqd', p, vh)
        o = o.transpose(0, 2, 1, 3).reshape(B, S, D)
        attn = o @ blk['wo']
        y = _layer_norm(x + attn, blk['ln1_g'], blk['ln1_b'])
        h = jax.nn.relu(y @ blk['w1'] + blk['b1'])
        ff = h @ blk['w2'] + blk['b2']
        x = _layer_norm(y + ff, blk['ln2_g'], blk['ln2_b'])
    pooled = jnp.max(x, axis=1)
    logits = pooled @ params['w_out'] + params['b_out']
    return jax.nn.log_softmax(logits, axis=-1)


# ----------------------------------------------------------------------------
if __name__ == "__main__":
    vocab_size = 50
    dmodel = 32
    heads = 4
    ffnn_hidden = 64
    output_size = 10
    n_layers = 2
    max_len = 16
    batch = 2
    seq_len = 8
    padding_idx = 0

    key = jax.random.PRNGKey(0)
    k_params, k_ids = jax.random.split(key)
    params = init_params(k_params, vocab_size, dmodel, ffnn_hidden,
                         output_size, n_layers)
    pos_enc = positional_encoding(max_len, dmodel, padding_idx)

    token_ids = jax.random.randint(k_ids, (batch, seq_len), 0, vocab_size,
                                   dtype=jnp.int32)
    input_lengths = jnp.full((batch,), seq_len, dtype=jnp.int32)

    out = transformer_forward(token_ids, input_lengths, params,
                              heads=heads, pos_enc=pos_enc, pooling='max')
    out = jax.block_until_ready(out)

    ref = jax.block_until_ready(_reference_forward(token_ids, params,
                                                   pos_enc, heads))

    assert out.shape == (batch, output_size)
    assert bool(jnp.all(jnp.isfinite(out)))
    max_diff = float(jnp.max(jnp.abs(out - ref)))
    # Loose tolerance covers MXU vs XLA f32-matmul precision differences;
    # structural errors would produce O(1) discrepancies.
    assert max_diff < 1e-1, f"max abs diff vs reference = {max_diff}"

    print("KERNEL_OK")
</pallas_src>

<mosaic_0001>
module attributes {stable_mosaic.version = 11 : i64} {
  func.func @_embed_pos_kernel(%arg0: memref<16x1xi32, #tpu.memory_space<vmem>>, %arg1: memref<50x32xf32, #tpu.memory_space<vmem>>, %arg2: memref<16x32xf32, #tpu.memory_space<vmem>>, %arg3: memref<16x32xf32, #tpu.memory_space<vmem>>) attributes {dimension_semantics = [], scalar_prefetch = 0 : i64, scratch_operands = 0 : i64, tpu.core_type = #tpu.core_type<tc>} {
    %c0 = arith.constant 0 : index
    %c0_0 = arith.constant 0 : index
    %0 = vector.load %arg0[%c0, %c0_0] : memref<16x1xi32, #tpu.memory_space<vmem>>, vector<16x1xi32>
    %1 = tpu.iota {dimensions = array<i32: 1>} : vector<16x50xi32>
    %2 = vector.broadcast %0 : vector<16x1xi32> to vector<16x50xi32>
    %3 = arith.cmpi eq, %1, %2 : vector<16x50xi32>
    %4 = arith.extui %3 : vector<16x50xi1> to vector<16x50xi32>
    %5 = arith.sitofp %4 : vector<16x50xi32> to vector<16x50xf32>
    %c0_1 = arith.constant 0 : index
    %c0_2 = arith.constant 0 : index
    %6 = vector.load %arg1[%c0_1, %c0_2] : memref<50x32xf32, #tpu.memory_space<vmem>>, vector<50x32xf32>
    %cst = arith.constant dense<0.000000e+00> : vector<16x32xf32>
    %7 = tpu.matmul %5, %6, %cst {dimension_numbers = #tpu.dot_dimension_numbers<[1], [0], [0], [1], [0, 0, 1, 1], [], []>} : vector<16x50xf32>, vector<50x32xf32>, vector<16x32xf32> -> vector<16x32xf32>
    %c0_3 = arith.constant 0 : index
    %c0_4 = arith.constant 0 : index
    %8 = vector.load %arg2[%c0_3, %c0_4] : memref<16x32xf32, #tpu.memory_space<vmem>>, vector<16x32xf32>
    %9 = arith.addf %7, %8 : vector<16x32xf32>
    %c0_5 = arith.constant 0 : index
    %c0_6 = arith.constant 0 : index
    %10 = vector.load %arg3[%c0_5, %c0_6] : memref<16x32xf32, #tpu.memory_space<vmem>>, vector<16x32xf32>
    tpu.vector_store %arg3[%c0_5, %c0_6], %9 {strides = array<i32>} : memref<16x32xf32, #tpu.memory_space<vmem>>, vector<16x32xf32>,
    return
  }
}

</mosaic_0001>

<bundles_post_ra>
// kernel: tpu_custom_call.1
= control target key start
LH: loop header
LB: loop body
LE: loop exit
PB: predicated region body
PF: predicated region fallthrough
CT: control target
= control target key end

     0   :  { %vm47_vm0 = vcmask 1041408   ;;  %v204_v2 = vmov 0   ;;  %s265_s0 = inlined_call_operand.vmem [shape: s32[16,1], index: 0, kind: input, shape index: {}]   ;;  %s266_s1 = inlined_call_operand.vmem [shape: f32[50,32], index: 1, kind: input, shape index: {}]   ;;  %s267_s2 = inlined_call_operand.vmem [shape: f32[16,32], index: 2, kind: input, shape index: {}]   ;;  %s268_s3 = inlined_call_operand.hbm [shape: f32[16,32], index: 3, kind: output, shape index: {}]  }
   0x1   :  { %v15_v0 = vld [vmem:[%s265_s0] sm:$0xff]  ;;  %v37_v1 = vld [vmem:[%s266_s1 + $0x30] sm:$0x3]  ;;  %181 = vset.pattern.permute.xlu0 %v204_v2  ;;  %v36_v3 = vld [vmem:[%s266_s1 + $0x28] sm:$0xff] }
   0x2   :  { %159 = vmatprep.subr.msk.mxu0 %vm47_vm0, %v37_v1  ;;  %20 = vperm.xlu0 %181, %v15_v0   ;;  %v35_v4 = vld [vmem:[%s266_s1 + $0x20] sm:$0xff]  ;;  %v16_v5 = vld [vmem:[%s265_s0 + $0x8] sm:$0xff] }
   0x3   :  { %160 = vmatpush3.msk.msra.mxu0 %vm47_vm0, %v37_v1 }
   0x4   :  { %161 = vmatprep.subr.mxu0 %v36_v3 }
   0x5   :  { %8 = vsyncpa [#allocation3], 0  ;;  %162 = vmatpush3.msra.mxu0 %v36_v3  ;;  %v34_v6 = vld [vmem:[%s266_s1 + $0x18] sm:$0xff]  ;;  %v33_v7 = vld [vmem:[%s266_s1 + $0x10] sm:$0xff]  ;;  %v17_v10 = vlaneseq  ;;  %vm40_vm1 = vcmask 408576   ;;  %v205_v13 = vmov 0.0  }
   0x6   :  { %163 = vmatprep.subr.mxu0 %v35_v4  ;;  %23 = vperm.xlu0 %181, %v16_v5   ;;  %v32_v8 = vld [vmem:[%s266_s1 + $0x8] sm:$0xff]  ;;  %v31_v9 = vld [vmem:[%s266_s1] sm:$0xff]  ;;  %s206_s1 = smov [#allocation2]   ;;  %vm126_vm4 = vcmask 261120  }
   0x7   :  { %164 = vmatpush3.msra.mxu0 %v35_v4  ;;  %v18_v11 = vand.u32 127, %v17_v10  ;;  %v39_v17 = vld [vmem:[%s267_s2 + $0x8] sm:$0xff]  ;;  %s134_s4 = sshll.u32 %s206_s1, 4  ;;  %v38_v19 = vld [vmem:[%s267_s2] sm:$0xff]  ;;  %s135_s4 = int_to_ptr.vmem [resolvable:$true] %s134_s4 }
   0x8   :  { %165 = vmatprep.subr.mxu0 %v34_v6  ;;  %s182_s7 = scalar_lea.vmem %s135_s4, 256  ;;  %p187_p1 = scmp.lt.s32.totalorder %s135_s4, %s135_s4 }
   0x9   :  { %166 = vmatpush3.msra.mxu0 %v34_v6  ;;  %p183_p0 = scmp.ne.s32.totalorder %s135_s4, %s182_s7  ;;  %p188_p2 = scmp.lt.s32.totalorder %s182_s7, %s182_s7 }
   0xa   :  { %167 = vmatprep.subr.mxu0 %v33_v7 }
   0xb   :  { %168 = vmatpush3.msra.mxu0 %v33_v7  ;;  %p189_p3 = por %p188_p2, %p187_p1 }
   0xc   :  { %169 = vmatprep.subr.mxu0 %v32_v8 }
   0xd   :  { %170 = vmatpush3.msra.mxu0 %v32_v8  ;;  %p190_p4 = pnand %p189_p3, %p183_p0 }
   0xe   :  { %171 = vmatprep.subr.mxu0 %v31_v9 }
   0xf   :  { %172 = vmatpush3.msra.mxu0 %v31_v9 }
  0x7d   :  { %v21_v12 = vpop.permute.xlu0 %20 }
  0x7e   :  { %vm25_vm2 = vcmp.eq.s32.totalorder %v18_v11, %v21_v12 }
  0x7f   :  { %v145_v14 = vsel %vm25_vm2, 1.0, %v205_v13 }
  0x80   :  { %173 = vmatprep.mubr.msk.f32.mxu0 %vm40_vm1, %v145_v14 }
  0x81   :  { %v24_v15 = vpop.permute.xlu0 %23 }
  0x82   :  { %vm26_vm3 = vcmp.eq.s32.totalorder %v18_v11, %v24_v15 }
  0x83   :  { %v146_v16 = vsel %vm26_vm3, 1.0, %v205_v13 }
  0x84   :  { %174 = vmatmul.mubr.msk.f32.vlgmr.msra.gmra.mxu0 %vm40_vm1, %v146_v16 }
 0x144   :  { %v175_v18 = vpop.f32.mrf.mxu0 }
 0x145   :  { %v123_v20 = vadd.f32 %v175_v18, %v39_v17 }
 0x146   :  { %v117_v21 = vpop.f32.mrf.mxu0 }
 0x147   :  { %128 = vst.msk [vmem:[#allocation2 + $0x8] sm:$0xff] %vm126_vm4, %v123_v20  ;;  %v118_v22 = vadd.f32 %v117_v21, %v38_v19 }
 0x149   :  { %127 = vst.msk [vmem:[#allocation2] sm:$0xff] %vm126_vm4, %v118_v22 }
 0x14a   :  { %193 = shalt.err (!%p190_p4)
}
 0x14b   :  { %s207_s8 = smov 128   ;;  %s208_s9 = smov 8  }
 0x14c   :  { %140 = dma.vmem_to_hbm [thread:$0]  %s135_s4, 256, %s268_s3, [#allocation3], %s207_s8, %s207_s8, %s208_s9  }
 0x14d   :  { %202 = dma.done.wait [#allocation3], 256  }
 0x14e   :  { %203 = vsyncadd [#allocation3], 4294967040 }
 0x14f   :  { %144 = vsyncpa [#allocation3], 1 }

</bundles_post_ra>
